<compile_context>
chip_gen: v7x
topology: tpu7x:2x2x1
jax: 0.10.0
libtpu: 0.0.40
codegen_flags: <defaults>
</compile_context>

<pallas_src>
import jax
import jax.numpy as jnp
from jax import lax
from jax.experimental import pallas as pl
from jax.experimental.pallas import tpu as pltpu

LANE = 128


def _round_up(x, m):
    return ((x + m - 1) // m) * m


# ----------------------------------------------------------------------------
# Kernel 1: grouped fused Linear -> ReLU (bf16 MXU, f32 accumulation, bf16 out)
# ----------------------------------------------------------------------------
def _grouped_linear_relu_kernel(gid_ref, x_ref, w_ref, b_ref, o_ref):
    # gid_ref (SMEM, scalar-prefetched) is consumed only by the index_maps.
    del gid_ref
    y = jnp.dot(x_ref[...], w_ref[0], preferred_element_type=jnp.float32)
    y = y + b_ref[0]
    o_ref[...] = jnp.maximum(y, 0.0).astype(o_ref.dtype)


def grouped_linear_relu(xs, gids, w_stack, b_stack, out_dim, tm=None):
    """Fused per-group y = relu(x @ W_g + b_g) for several node types.

    xs:      list of (N_g, in_dim_g) feature matrices (one K-bucket).
    gids:    list of int group ids into w_stack / b_stack.
    w_stack: (G, K_pad, D_pad) bf16 (zero padded).
    b_stack: (G, 1, D_pad) f32 (zero padded).
    Returns list of (N_g, out_dim) f32 outputs.
    """
    g_count, k_pad, d_pad = w_stack.shape
    rows = [int(x.shape[0]) for x in xs]
    max_rows = max(rows)
    if tm is None:
        # Big row tile amortizes ~0.35us grid-step overhead; multiple of 16
        # for bf16 sublane packing. VMEM footprint at tm=512:
        # x 128KiB + out 128KiB + w 32KiB per buffer -> well under limits.
        tm = min(512, _round_up(max_rows, 16))

    xs_pad, tile_gids, offsets = [], [], []
    off = 0
    for x, g in zip(xs, gids):
        n, k = x.shape
        n_pad = _round_up(n, tm)
        xp = jnp.pad(x.astype(jnp.bfloat16), ((0, n_pad - n), (0, k_pad - k)))
        xs_pad.append(xp)
        tile_gids += [g] * (n_pad // tm)
        offsets.append((off, n))
        off += n_pad

    x_cat = xs_pad[0] if len(xs_pad) == 1 else jnp.concatenate(xs_pad, axis=0)
    gid_arr = jnp.asarray(tile_gids, jnp.int32)        # per-row-tile group id
    num_tiles = off // tm

    flops = 2 * off * k_pad * d_pad
    bytes_accessed = (off * k_pad * 2                    # x (bf16)
                      + g_count * k_pad * d_pad * 2      # weights (bf16)
                      + g_count * d_pad * 4              # bias (f32)
                      + off * d_pad * 2)                 # out (bf16)

    out = pl.pallas_call(
        _grouped_linear_relu_kernel,
        out_shape=jax.ShapeDtypeStruct((off, d_pad), jnp.bfloat16),
        grid_spec=pltpu.PrefetchScalarGridSpec(
            num_scalar_prefetch=1,
            grid=(num_tiles,),
            in_specs=[
                pl.BlockSpec((tm, k_pad), lambda i, gid: (i, 0)),
                pl.BlockSpec((1, k_pad, d_pad), lambda i, gid: (gid[i], 0, 0)),
                pl.BlockSpec((1, 1, d_pad), lambda i, gid: (gid[i], 0, 0)),
            ],
            out_specs=pl.BlockSpec((tm, d_pad), lambda i, gid: (i, 0)),
        ),
        compiler_params=pltpu.CompilerParams(
            dimension_semantics=("parallel",),        # shard row tiles across TCs
            vmem_limit_bytes=32 * 1024 * 1024,
        ),
        cost_estimate=pl.CostEstimate(
            flops=flops, transcendentals=0, bytes_accessed=bytes_accessed),
    )(gid_arr, x_cat, w_stack, b_stack)

    return [out[s:s + n, :out_dim].astype(jnp.float32) for (s, n) in offsets]


# ----------------------------------------------------------------------------
# Kernel 2: embedding lookup — table stays in HBM, per-row DMA gather
# ----------------------------------------------------------------------------
def _embed_dma_gather_kernel(idx_ref, tab_hbm, o_ref, buf, sem):
    tr = o_ref.shape[0]
    base = pl.program_id(0) * tr

    # Issue all row DMAs (they overlap each other), then drain them all.
    def _issue(r, carry):
        row = idx_ref[base + r]
        pltpu.make_async_copy(tab_hbm.at[row], buf.at[r], sem.at[0]).start()
        return carry

    lax.fori_loop(0, tr, _issue, None)

    def _drain(r, carry):
        pltpu.make_async_copy(tab_hbm.at[0], buf.at[r], sem.at[0]).wait()
        return carry

    lax.fori_loop(0, tr, _drain, None)

    o_ref[...] = buf[...]


def embedding_gather(table_pad, idx, out_dim, tr=None):
    """table_pad: (E, D_pad) f32 (stays in HBM), idx: (N,) int -> (N, out_dim) f32."""
    e, d_pad = table_pad.shape
    n = int(idx.shape[0])
    if tr is None:
        tr = min(128, _round_up(n, 8))           # rows gathered per grid step
    n_pad = _round_up(n, tr)

    idx_pad = jnp.pad(idx.astype(jnp.int32), (0, n_pad - n))
    # Clip guards padded rows (index 0) and HW-fatal OOB DMAs; real caller
    # indices are assumed in-range (a debug_check could be added in interpret
    # mode if stricter validation is desired).
    idx_pad = jnp.clip(idx_pad, 0, e - 1)

    itemsize = jnp.dtype(table_pad.dtype).itemsize
    out = pl.pallas_call(
        _embed_dma_gather_kernel,
        out_shape=jax.ShapeDtypeStruct((n_pad, d_pad), table_pad.dtype),
        grid_spec=pltpu.PrefetchScalarGridSpec(
            num_scalar_prefetch=1,
            grid=(n_pad // tr,),
            in_specs=[pl.BlockSpec(memory_space=pl.ANY)],   # table stays in HBM
            out_specs=pl.BlockSpec((tr, d_pad), lambda i, idx_ref: (i, 0)),
            scratch_shapes=[
                pltpu.VMEM((tr, d_pad), table_pad.dtype),
                pltpu.SemaphoreType.DMA((1,)),
            ],
        ),
        compiler_params=pltpu.CompilerParams(
            dimension_semantics=("parallel",),
            vmem_limit_bytes=32 * 1024 * 1024,
        ),
        cost_estimate=pl.CostEstimate(
            flops=0, transcendentals=0,
            bytes_accessed=2 * n_pad * d_pad * itemsize + 4 * n_pad),
    )(idx_pad, table_pad)
    return out[:n, :out_dim]


# ----------------------------------------------------------------------------
# Parameter init (deterministic, mirrors the PyTorch module's init)
# ----------------------------------------------------------------------------
def xavier_uniform(key, shape):
    fan_out, fan_in = shape[0], shape[1]
    bound = (6.0 / (fan_in + fan_out)) ** 0.5
    return jax.random.uniform(key, shape, jnp.float32, -bound, bound)


class HeteroNodeFeatureEncoderPallas:
    """JAX/Pallas re-implementation of HeteroNodeFeatureEncoder (eval mode)."""

    def __init__(self, key, embedding_dim, num_nodes_dict, node_attr_shape):
        self.embedding_dim = embedding_dim
        d_pad = _round_up(embedding_dim, LANE)
        self.d_pad = d_pad

        # --- Embeddings for node types WITHOUT attributes ------------------
        non_attr_ntypes = sorted(set(num_nodes_dict) - set(node_attr_shape))
        self.emb_tables = {}        # f32 (E, D) reference copies
        self.emb_row_offset = {}    # ntype -> row offset into the stacked table
        stacked, row_off = [], 0
        for ntype in non_attr_ntypes:
            key, k = jax.random.split(key)
            tab = xavier_uniform(k, (num_nodes_dict[ntype], embedding_dim))
            self.emb_tables[ntype] = tab
            self.emb_row_offset[ntype] = row_off
            row_off += tab.shape[0]
            stacked.append(jnp.pad(tab, ((0, 0), (0, d_pad - embedding_dim))))
        self.emb_table_stacked = (jnp.concatenate(stacked, axis=0)
                                  if stacked else None)   # (E_total, D_pad) f32, HBM

        # --- Linear projections, bucketed by rounded-up input width --------
        lin_ntypes = [nt for nt in sorted(node_attr_shape)
                      if node_attr_shape[nt] and node_attr_shape[nt] != embedding_dim]
        self.lin_in_dims = {nt: node_attr_shape[nt] for nt in lin_ntypes}

        buckets = {}
        for nt in lin_ntypes:
            kb = _round_up(node_attr_shape[nt], LANE)
            buckets.setdefault(kb, []).append(nt)

        self.lin_bucket = {}   # ntype -> (k_pad bucket key, group idx in bucket)
        self.w_stacks = {}     # k_pad -> (G, k_pad, d_pad) bf16
        self.b_stacks = {}     # k_pad -> (G, 1, d_pad) f32
        for kb, ntypes in sorted(buckets.items()):
            w_stack = jnp.zeros((len(ntypes), kb, d_pad), jnp.float32)
            b_stack = jnp.zeros((len(ntypes), 1, d_pad), jnp.float32)
            for g, nt in enumerate(ntypes):
                in_dim = node_attr_shape[nt]
                key, kw, kbias = jax.random.split(key, 3)
                # Weight: xavier_uniform_ (reset_parameters). Bias: PyTorch
                # nn.Linear default U(-1/sqrt(fan_in), 1/sqrt(fan_in)).
                w = xavier_uniform(kw, (embedding_dim, in_dim))      # (out, in)
                bb = 1.0 / (in_dim ** 0.5)
                b = jax.random.uniform(kbias, (embedding_dim,), jnp.float32, -bb, bb)
                w_stack = w_stack.at[g, :in_dim, :embedding_dim].set(w.T)
                b_stack = b_stack.at[g, 0, :embedding_dim].set(b)
                self.lin_bucket[nt] = (kb, g)
            self.w_stacks[kb] = w_stack.astype(jnp.bfloat16)   # MXU-native weights
            self.b_stacks[kb] = b_stack

    def forward(self, feats, global_node_index):
        h_dict = dict(feats)

        # --- One batched gather for all non-attribute node types -----------
        emb_ntypes = [nt for nt, idx in global_node_index.items()
                      if idx.size != 0 and nt not in h_dict and nt in self.emb_tables]
        if emb_ntypes:
            idx_parts, counts = [], []
            for nt in emb_ntypes:
                idx_parts.append(global_node_index[nt].astype(jnp.int32)
                                 + self.emb_row_offset[nt])
                counts.append(int(global_node_index[nt].shape[0]))
            idx_all = (idx_parts[0] if len(idx_parts) == 1
                       else jnp.concatenate(idx_parts))
            gathered = embedding_gather(self.emb_table_stacked, idx_all,
                                        self.embedding_dim)
            s = 0
            for nt, c in zip(emb_ntypes, counts):
                h_dict[nt] = gathered[s:s + c]
                s += c

        # --- Grouped Linear -> ReLU -> Dropout(eval=identity), per K-bucket -
        dense_ntypes = [nt for nt, idx in global_node_index.items()
                        if idx.size != 0 and nt in self.lin_bucket and nt in h_dict]
        by_bucket = {}
        for nt in dense_ntypes:
            kb, g = self.lin_bucket[nt]
            by_bucket.setdefault(kb, []).append((nt, g))
        for kb, items in by_bucket.items():
            outs = grouped_linear_relu(
                [h_dict[nt] for nt, _ in items],
                [g for _, g in items],
                self.w_stacks[kb], self.b_stacks[kb], self.embedding_dim)
            for (nt, _), o in zip(items, outs):
                h_dict[nt] = o
        return h_dict


# ----------------------------------------------------------------------------
# Reference (plain jnp) for a correctness check
# ----------------------------------------------------------------------------
def reference_forward(enc, feats, global_node_index):
    h = dict(feats)
    d = enc.embedding_dim
    for ntype, idx in global_node_index.items():
        if idx.size == 0:
            continue
        if ntype not in h and ntype in enc.emb_tables:
            h[ntype] = enc.emb_tables[ntype][idx]
        if ntype in enc.lin_bucket:
            kb, g = enc.lin_bucket[ntype]
            in_dim = enc.lin_in_dims[ntype]
            x = h[ntype].astype(jnp.bfloat16).astype(jnp.float32)
            w = enc.w_stacks[kb][g, :in_dim, :d].astype(jnp.float32)
            b = enc.b_stacks[kb][g, 0, :d]
            y = jnp.maximum(jnp.dot(x, w, precision="highest") + b, 0.0)
            # Kernel writes bf16 (re-upcast in the wrapper); mirror the round.
            h[ntype] = y.astype(jnp.bfloat16).astype(jnp.float32)
    return h


if __name__ == "__main__":
    key = jax.random.PRNGKey(0)

    embedding_dim = 32
    num_nodes_dict = {"paper": 64, "author": 64, "venue": 64, "term": 40}
    node_attr_shape = {"paper": 48, "author": 24}   # venue/term: no attrs -> embeddings

    k_enc, k_fp, k_fa, k_ip, k_ia, k_iv, k_it = jax.random.split(key, 7)
    enc = HeteroNodeFeatureEncoderPallas(
        k_enc, embedding_dim, num_nodes_dict, node_attr_shape)

    n_paper, n_author, n_venue, n_term = 16, 16, 8, 12
    feats = {
        "paper": jax.random.normal(k_fp, (n_paper, 48), jnp.float32),
        "author": jax.random.normal(k_fa, (n_author, 24), jnp.float32),
    }
    global_node_index = {
        "paper": jax.random.randint(k_ip, (n_paper,), 0, 64, jnp.int32),
        "author": jax.random.randint(k_ia, (n_author,), 0, 64, jnp.int32),
        "venue": jax.random.randint(k_iv, (n_venue,), 0, 64, jnp.int32),
        "term": jax.random.randint(k_it, (n_term,), 0, 40, jnp.int32),
    }

    h_dict = enc.forward(feats, global_node_index)
    jax.block_until_ready(h_dict)

    ref = reference_forward(enc, feats, global_node_index)
    expected_rows = {"paper": n_paper, "author": n_author,
                     "venue": n_venue, "term": n_term}
    for ntype in ("paper", "author", "venue", "term"):
        assert h_dict[ntype].shape == (expected_rows[ntype], embedding_dim), (
            ntype, h_dict[ntype].shape)
        assert jnp.allclose(h_dict[ntype], ref[ntype], atol=1e-2, rtol=1e-2), ntype

    print("KERNEL_OK")
</pallas_src>

<mosaic_0001>
module attributes {stable_mosaic.version = 11 : i64} {
  func.func @_embed_dma_gather_kernel(%arg0: i32, %arg1: memref<24xi32, #tpu.memory_space<smem>>, %arg2: memref<104x128xf32, #tpu.memory_space<any>>, %arg3: memref<24x128xf32, #tpu.memory_space<vmem>>, %arg4: memref<24x128xf32, #tpu.memory_space<vmem>>, %arg5: memref<1x!tpu.dma_semaphore, #tpu.memory_space<semaphore_mem>>) attributes {dimension_semantics = [#tpu.dimension_semantics<parallel>], iteration_bounds = array<i64: 1>, scalar_prefetch = 1 : i64, scratch_operands = 2 : i64, tpu.core_type = #tpu.core_type<tc>, window_params = [{}, {transform_indices = @transform_1, window_bounds = array<i64: 24, 128>}]} {
    %c24_i32 = arith.constant 24 : i32
    %0 = arith.muli %arg0, %c24_i32 : i32
    %c0_i32 = arith.constant 0 : i32
    %c24_i32_0 = arith.constant 24 : i32
    %1 = arith.addi %c0_i32, %c24_i32_0 : i32
    %c1_i32 = arith.constant 1 : i32
    scf.for %arg6 = %c0_i32 to %1 step %c1_i32  : i32 {
      %5 = arith.addi %0, %arg6 : i32
      %6 = arith.index_cast %5 : i32 to index
      %7 = memref.load %arg1[%6] : memref<24xi32, #tpu.memory_space<smem>>
      %c0_i32_9 = arith.constant 0 : i32
      %c0_i32_10 = arith.constant 0 : i32
      %8 = tpu.memref_slice %arg2[%7, %c0_i32_10] : memref<104x128xf32, #tpu.memory_space<any>> -> memref<1x128xf32, #tpu.memory_space<any>>
      %9 = tpu.memref_squeeze %8 : memref<1x128xf32, #tpu.memory_space<any>> -> memref<128xf32, #tpu.memory_space<any>>
      %c0_i32_11 = arith.constant 0 : i32
      %10 = tpu.memref_slice %arg4[%arg6, %c0_i32_11] : memref<24x128xf32, #tpu.memory_space<vmem>> -> memref<1x128xf32, #tpu.memory_space<vmem>>
      %11 = tpu.memref_squeeze %10 : memref<1x128xf32, #tpu.memory_space<vmem>> -> memref<128xf32, #tpu.memory_space<vmem>>
      %12 = tpu.memref_slice %arg5[%c0_i32_9] : memref<1x!tpu.dma_semaphore, #tpu.memory_space<semaphore_mem>> -> memref<1x!tpu.dma_semaphore, #tpu.memory_space<semaphore_mem>>
      %13 = tpu.memref_squeeze %12 : memref<1x!tpu.dma_semaphore, #tpu.memory_space<semaphore_mem>> -> memref<!tpu.dma_semaphore, #tpu.memory_space<semaphore_mem>>
      tpu.enqueue_dma source(%9 : memref<128xf32, #tpu.memory_space<any>>) target(%11 : memref<128xf32, #tpu.memory_space<vmem>>) target_semaphore(%13 : memref<!tpu.dma_semaphore, #tpu.memory_space<semaphore_mem>>)
    }
    %c24_i32_1 = arith.constant 24 : i32
    %c0_i32_2 = arith.constant 0 : i32
    %c24_i32_3 = arith.constant 24 : i32
    %2 = arith.addi %c0_i32_2, %c24_i32_3 : i32
    %c1_i32_4 = arith.constant 1 : i32
    scf.for %arg6 = %c0_i32_2 to %2 step %c1_i32_4  : i32 {
      %c0_i32_9 = arith.constant 0 : i32
      %c0_i32_10 = arith.constant 0 : i32
      %c0_i32_11 = arith.constant 0 : i32
      %5 = tpu.memref_slice %arg2[%c0_i32_9, %c0_i32_11] : memref<104x128xf32, #tpu.memory_space<any>> -> memref<1x128xf32, #tpu.memory_space<any>>
      %6 = tpu.memref_squeeze %5 : memref<1x128xf32, #tpu.memory_space<any>> -> memref<128xf32, #tpu.memory_space<any>>
      %c0_i32_12 = arith.constant 0 : i32
      %7 = tpu.memref_slice %arg4[%arg6, %c0_i32_12] : memref<24x128xf32, #tpu.memory_space<vmem>> -> memref<1x128xf32, #tpu.memory_space<vmem>>
      %8 = tpu.memref_squeeze %7 : memref<1x128xf32, #tpu.memory_space<vmem>> -> memref<128xf32, #tpu.memory_space<vmem>>
      %9 = tpu.memref_slice %arg5[%c0_i32_10] : memref<1x!tpu.dma_semaphore, #tpu.memory_space<semaphore_mem>> -> memref<1x!tpu.dma_semaphore, #tpu.memory_space<semaphore_mem>>
      %10 = tpu.memref_squeeze %9 : memref<1x!tpu.dma_semaphore, #tpu.memory_space<semaphore_mem>> -> memref<!tpu.dma_semaphore, #tpu.memory_space<semaphore_mem>>
      tpu.wait_dma2 semaphore(%10 : memref<!tpu.dma_semaphore, #tpu.memory_space<semaphore_mem>>) src(%6 : memref<128xf32, #tpu.memory_space<any>>) dst(%8 : memref<128xf32, #tpu.memory_space<vmem>>)
    }
    %c24_i32_5 = arith.constant 24 : i32
    %c0 = arith.constant 0 : index
    %c0_6 = arith.constant 0 : index
    %3 = vector.load %arg4[%c0, %c0_6] : memref<24x128xf32, #tpu.memory_space<vmem>>, vector<24x128xf32>
    %c0_7 = arith.constant 0 : index
    %c0_8 = arith.constant 0 : index
    %4 = vector.load %arg3[%c0_7, %c0_8] : memref<24x128xf32, #tpu.memory_space<vmem>>, vector<24x128xf32>
    tpu.vector_store %arg3[%c0_7, %c0_8], %3 {strides = array<i32>} : memref<24x128xf32, #tpu.memory_space<vmem>>, vector<24x128xf32>,
    return
  }
  func.func @transform_1(%arg0: i32, %arg1: memref<24xi32, #tpu.memory_space<smem>>) -> (i32, i32) {
    %c0_i32 = arith.constant 0 : i32
    %c0_i32_0 = arith.constant 0 : i32
    return %arg0, %c0_i32 : i32, i32
  }
}

</mosaic_0001>

<bundles_post_ra>
// kernel: tpu_custom_call.1
= control target key start
LH: loop header
LB: loop body
LE: loop exit
PB: predicated region body
PF: predicated region fallthrough
CT: control target
= control target key end

     0   :  { %s247_s0 = inlined_call_operand.hbm [shape: s32[24], index: 0, kind: input, shape index: {}]   ;;  %s248_s1 = inlined_call_operand.hbm [shape: f32[104,128], index: 1, kind: input, shape index: {}]   ;;  %s249_s2 = inlined_call_operand.hbm [shape: f32[24,128], index: 2, kind: output, shape index: {}]  }
   0x1   :  { %s106_s11 = scalar_lea.hbm %s247_s0, 16 }
   0x2   :  { %p107_p0 = scmp.ne.s32.totalorder %s247_s0, %s106_s11  ;;  %p110_p1 = scmp.lt.u32.totalorder %s106_s11, %s247_s0 }
   0x4   :  { %p112_p2 = pnand %p110_p1, %p107_p0 }
   0x6   :  { %115 = shalt.err (!%p112_p2)  }
   0x7   :  { %s184_s16 = smov [#allocation5]  }
   0x8   :  { %8 = dma.hbm_to_smem %s247_s0, 16, %s184_s16, [#allocation4] }
   0x9   :  { %170 = dma.done.wait [#allocation4], 16 }
   0xa   :  { %171 = vsyncadd [#allocation4], 4294967280 }
   0xb   :  { %10 = sfence }
   0xc   :  { %11 = vsyncpa [#allocation7], 0  ;;  %s216_s19 = smov 0  }
   0xd LB: > { %s20_s20 = sld [smem:[#allocation5 + %s178_s19]]  ;;  %s23_s21 = scalar_lea.vmem [#allocation2], %s178_s19  ;;  %s178_s19 = sphi %s216_s19, %s18_s19  }
   0xe   : > { %s31_s22 = sshll.u32 %s23_s21, 4  ;;  %s118_s29 = scalar_lea.hbm %s248_s1, 1664  ;;  %s32_s22 = int_to_ptr.vmem [resolvable:$true] %s31_s22 }
  0x13   : > { %s84_s23 = sshll.u32 %s20_s20, 4 }
  0x14   : > { %s22_s25 = scalar_lea.hbm %s248_s1, %s84_s23 }
  0x15   : > { %s116_s26 = scalar_lea.hbm %s22_s25, 16  ;;  %p119_p4 = scmp.lt.u32.totalorder %s22_s25, %s248_s1 }
  0x16   : > { %p117_p3 = scmp.ne.s32.totalorder %s22_s25, %s116_s26  ;;  %p120_p5 = scmp.lt.u32.totalorder %s118_s29, %s116_s26 }
  0x17   : > { %p122_p7 = scmp.lt.u32.totalorder %s116_s26, %s22_s25 }
  0x18   : > { %p121_p6 = por %p120_p5, %p119_p4 }
  0x1a   : > { %p123_p8 = por %p122_p7, %p121_p6 }
  0x1c   : > { %p124_p9 = pnand %p123_p8, %p117_p3 }
  0x1e   : > { %127 = shalt.err (!%p124_p9)  }
  0x1f   : > { %s128_s4 = scalar_lea.vmem %s32_s22, 16  ;;  %s185_s5 = smov [#allocation2]  }
  0x20   : > { %p129_p10 = scmp.ne.s32.totalorder %s32_s22, %s128_s4  ;;  %s130_s6 = sshll.u32 %s185_s5, 4  ;;  %s131_s6 = int_to_ptr.vmem [resolvable:$false] %s130_s6 }
  0x21   : > { %s132_s7 = scalar_lea.vmem %s131_s6, 384  ;;  %p133_p11 = scmp.lt.s32.totalorder %s32_s22, %s131_s6 }
  0x22   : > { %p134_p12 = scmp.lt.s32.totalorder %s132_s7, %s128_s4 }
  0x24   : > { %p135_p13 = por %p134_p12, %p133_p11 }
  0x26   : > { %p136_p0 = pnand %p135_p13, %p129_p10 }
  0x28   : > { %139 = shalt.err (!%p136_p0)  }
  0x29   : > { %34 = dma.hbm_to_vmem [thread:$0]  %s22_s25, 16, %s32_s22, [#allocation3] }
  0x2a   : > { %s18_s19 = sadd.s32 1, %s178_s19  }
  0x2b   : > { %p15_p1 = scmp.ge.s32.totalorder %s18_s19, 24  }
  0x2c   :  { %s180_s8 = smov (%p15_p1), 0  }
  0x2d   :  { %17 = sbr.rel (!%p15_p1) target bundleno = 13 (0xd), region = 40 }
  0x34 LB: > { %172 = dma.done.wait [#allocation3], 16  ;;  %s182_s8 = sphi %s180_s8, %s40_s8  }
  0x35   : > { %173 = vsyncadd [#allocation3], 4294967280  ;;  %s40_s8 = sadd.s32 1, %s182_s8  }
  0x36   : > { %p37_p2 = scmp.ge.s32.totalorder %s40_s8, 24  }
  0x37   :  { %v43_v0 = vld [vmem:[#allocation2] sm:$0xff] (%p37_p2)  ;;  %v44_v1 = vld [vmem:[#allocation2 + $0x8] sm:$0xff] (%p37_p2)  ;;  %v45_v2 = vld [vmem:[#allocation2 + $0x10] sm:$0xff] (%p37_p2)  ;;  %s186_s9 = smov (%p37_p2), [#allocation6]  }
  0x38   :  { %39 = sbr.rel (!%p37_p2) target bundleno = 52 (0x34), region = 51  ;;  %46 = vst [vmem:[#allocation6] sm:$0xff] (%p37_p2), %v43_v0  ;;  %47 = vst [vmem:[#allocation6 + $0x8] sm:$0xff] (%p37_p2), %v44_v1  ;;  %s54_s10 = sshll.u32 (%p37_p2), %s186_s9, 4  ;;  %s55_s10 = int_to_ptr.vmem [resolvable:$true] %s54_s10 }
  0x39   :  { %48 = vst [vmem:[#allocation6 + $0x10] sm:$0xff] (%p37_p2), %v45_v2  ;;  %s140_s11 = scalar_lea.vmem (%p37_p2), %s55_s10, 384  ;;  %p145_p4 = scmp.lt.s32.totalorder (%p37_p2), %s55_s10, %s55_s10 }
  0x3a   :  { %p141_p3 = scmp.ne.s32.totalorder (%p37_p2), %s55_s10, %s140_s11  ;;  %p146_p5 = scmp.lt.s32.totalorder (%p37_p2), %s140_s11, %s140_s11 }
  0x3c   :  { %p147_p6 = por (%p37_p2), %p146_p5, %p145_p4 }
  0x3e   :  { %p148_p7 = pnand (%p37_p2), %p147_p6, %p141_p3 }
  0x40   :  { %151 = shalt.err (!%p148_p7)
}
  0x41   :  { %s152_s13 = scalar_lea.hbm %s249_s2, 384 }
  0x42   :  { %p153_p8 = scmp.ne.s32.totalorder %s249_s2, %s152_s13  ;;  %p156_p9 = scmp.lt.u32.totalorder %s152_s13, %s249_s2 }
  0x44   :  { %p158_p10 = pnand %p156_p9, %p153_p8 }
  0x46   :  { %161 = shalt.err (!%p158_p10)
}
  0x47   :  { %s187_s18 = smov 128   ;;  %s188_s19 = smov 8  }
  0x48   :  { %60 = dma.vmem_to_hbm [thread:$0]  %s55_s10, 384, %s249_s2, [#allocation7], %s187_s18, %s187_s18, %s188_s19  }
  0x49   :  { %174 = dma.done.wait [#allocation7], 384  }
  0x4a   :  { %175 = vsyncadd [#allocation7], 4294966912 }
  0x4b   :  { %64 = vsyncpa [#allocation7], 1 }
  0x4c   :  { %65 = vsyncmov [#allocation3] }
  0x4f   :  { %s66_s22 = vpop.sfrf %65 }
  0x50   :  { %p85_p11 = scmp.ne.s32.totalorder %s66_s22, 0 }
  0x52   :  { %70 = shalt.err (%p85_p11)  }

</bundles_post_ra>
